<compile_context>
chip_gen: v7x
topology: tpu7x:2x2x1
jax: 0.10.0
libtpu: 0.0.40
codegen_flags: <defaults>
</compile_context>

<pallas_src>
import math

import jax
import jax.numpy as jnp
from jax.experimental import pallas as pl
from jax.experimental.pallas import tpu as pltpu

NUM_GROUPS = 32          # nn.GroupNorm(32, channels)
GN_EPS = 1e-5
_VMEM_LIMIT = 48 * 1024 * 1024


# --------------------------------------------------------------------------
# Kernel 1: GroupNorm-apply + QKV 1x1-conv projection (bf16 MXU, f32 acc).
# --------------------------------------------------------------------------
def _qkv_kernel(x_ref, gscale_ref, gshift_ref, wqkv_ref, bqkv_ref,
                q_ref, k_ref, v_ref):
    C = q_ref.shape[-1]
    # Exact GroupNorm: per-(b, c) scale/shift precomputed in the wrapper.
    xn = x_ref[0] * gscale_ref[0] + gshift_ref[0]                # (TL, C) f32
    qkv = jnp.dot(xn.astype(jnp.bfloat16), wqkv_ref[...],
                  preferred_element_type=jnp.float32)            # (TL, 3C) f32
    qkv = qkv + bqkv_ref[...]
    # C is a multiple of 128 in the test config -> lane-aligned static slices.
    q_ref[0] = qkv[:, 0 * C:1 * C].astype(jnp.bfloat16)          # pre-scaled q
    k_ref[0] = qkv[:, 1 * C:2 * C].astype(jnp.bfloat16)          # pre-scaled k
    v_ref[0] = qkv[:, 2 * C:3 * C].astype(jnp.bfloat16)


# --------------------------------------------------------------------------
# Kernel 2: per-head attention + output projection + residual.
# grid = (B, num_q_tiles, num_heads); head axis is the reduction axis and the
# output tile (resident across it) is the accumulator.
# --------------------------------------------------------------------------
def _attn_kernel(q_ref, k_ref, v_ref, xres_ref, wp_ref, bproj_ref, out_ref):
    h = pl.program_id(2)

    @pl.when(h == 0)
    def _init():
        # residual + projection bias; per-head contributions are added below.
        out_ref[0] = xres_ref[0] + bproj_ref[...]

    q = q_ref[0, 0]                                              # (TQ, D) bf16
    k = k_ref[0, 0]                                              # (L,  D) bf16
    v = v_ref[0, 0]                                              # (L,  D) bf16

    # scores (f32 accumulation on the MXU); softmax statistics stay in f32.
    s = jnp.einsum("qd,kd->qk", q, k,
                   preferred_element_type=jnp.float32)           # (TQ, L) f32
    m = jnp.max(s, axis=-1, keepdims=True)
    e = jnp.exp(s - m)                                           # EUP
    inv_l = pl.reciprocal(jnp.sum(e, axis=-1, keepdims=True), approx=True)
    p = (e * inv_l).astype(jnp.bfloat16)                         # (TQ, L)

    o = jnp.dot(p, v, preferred_element_type=jnp.float32)        # (TQ, D) f32
    # This head's slice of the output projection, accumulated into out tile.
    out_ref[0] += jnp.dot(o.astype(jnp.bfloat16), wp_ref[0],
                          preferred_element_type=jnp.float32)    # (TQ, C)


def _pick_tile(n, target):
    """Largest multiple of 8 <= target that divides n (else n itself)."""
    if n <= target:
        return n
    t = (target // 8) * 8
    while t >= 8:
        if n % t == 0:
            return t
        t -= 8
    return n


def self_attention_pallas(x_nchw, params, num_heads=8, q_tile=128, l_tile=512):
    """x_nchw: (B, C, H, W) float32.  Returns (B, C, H, W)."""
    B, C, H, W = x_nchw.shape
    L = H * W
    G = NUM_GROUPS
    D = C // num_heads

    # ---- glue: NCHW -> (B, L, C) (layout plumbing, one pass) ---------------
    x = jnp.transpose(x_nchw.reshape(B, C, L), (0, 2, 1)).astype(jnp.float32)

    # ---- GroupNorm stats (exact two-pass, f32) folded with gamma/beta ------
    xg = x_nchw.astype(jnp.float32).reshape(B, G, (C // G) * L)
    g_mean = jnp.mean(xg, axis=-1)                                   # (B, G)
    g_var = jnp.mean(jnp.square(xg - g_mean[..., None]), axis=-1)    # (B, G)
    g_inv = jax.lax.rsqrt(g_var + GN_EPS)
    mean_c = jnp.repeat(g_mean, C // G, axis=1)                      # (B, C)
    inv_c = jnp.repeat(g_inv, C // G, axis=1)                        # (B, C)
    gamma = params["gamma"].astype(jnp.float32)
    beta = params["beta"].astype(jnp.float32)
    gn_scale = (gamma[None, :] * inv_c)[:, None, :]                  # (B,1,C)
    gn_shift = (beta[None, :] - mean_c * gamma[None, :] * inv_c)[:, None, :]

    # ---- weights: fold attention scale into Q/K columns; cast bf16 ---------
    attn_scale = 1.0 / math.sqrt(math.sqrt(D))
    col_scale = jnp.concatenate(
        [jnp.full((2 * C,), attn_scale, jnp.float32),
         jnp.ones((C,), jnp.float32)])
    wqkv = params["wqkv"].reshape(3 * C, C).astype(jnp.float32)      # (3C, C)
    wqkv_t = (wqkv.T * col_scale[None, :]).astype(jnp.bfloat16)      # (C, 3C)
    bqkv = (params["bqkv"].astype(jnp.float32) * col_scale)[None, :] # (1, 3C)
    wproj_t = jnp.transpose(params["wproj"].reshape(C, C)).astype(jnp.bfloat16)
    wp3 = wproj_t.reshape(num_heads, D, C)                           # (H, D, C)
    bproj = params["bproj"].reshape(1, C).astype(jnp.float32)

    # ---- stage 1: GroupNorm-apply + QKV projection --------------------------
    TL = _pick_tile(L, l_tile)
    n_l = L // TL
    q, k, v = pl.pallas_call(
        _qkv_kernel,
        out_shape=[jax.ShapeDtypeStruct((B, L, C), jnp.bfloat16)] * 3,
        grid=(B, n_l),
        in_specs=[
            pl.BlockSpec((1, TL, C), lambda b, l: (b, l, 0)),        # x tile
            pl.BlockSpec((1, 1, C), lambda b, l: (b, 0, 0)),         # gn scale
            pl.BlockSpec((1, 1, C), lambda b, l: (b, 0, 0)),         # gn shift
            pl.BlockSpec((C, 3 * C), lambda b, l: (0, 0)),           # Wqkv^T
            pl.BlockSpec((1, 3 * C), lambda b, l: (0, 0)),           # bqkv
        ],
        out_specs=[pl.BlockSpec((1, TL, C), lambda b, l: (b, l, 0))] * 3,
        compiler_params=pltpu.CompilerParams(
            dimension_semantics=("parallel", "parallel"),
            vmem_limit_bytes=_VMEM_LIMIT),
    )(x, gn_scale, gn_shift, wqkv_t, bqkv)

    # ---- glue: head-split (B, L, C) -> (B, H, L, D) (layout plumbing) ------
    qh = jnp.transpose(q.reshape(B, L, num_heads, D), (0, 2, 1, 3))
    kh = jnp.transpose(k.reshape(B, L, num_heads, D), (0, 2, 1, 3))
    vh = jnp.transpose(v.reshape(B, L, num_heads, D), (0, 2, 1, 3))

    # ---- stage 2: attention + proj + residual -------------------------------
    TQ = _pick_tile(L, q_tile)
    n_q = L // TQ
    out = pl.pallas_call(
        _attn_kernel,
        out_shape=jax.ShapeDtypeStruct((B, L, C), jnp.float32),
        grid=(B, n_q, num_heads),
        in_specs=[
            pl.BlockSpec((1, 1, TQ, D), lambda b, qi, h: (b, h, qi, 0)),  # q
            pl.BlockSpec((1, 1, L, D), lambda b, qi, h: (b, h, 0, 0)),    # k
            pl.BlockSpec((1, 1, L, D), lambda b, qi, h: (b, h, 0, 0)),    # v
            pl.BlockSpec((1, TQ, C), lambda b, qi, h: (b, qi, 0)),        # x res
            pl.BlockSpec((1, D, C), lambda b, qi, h: (h, 0, 0)),          # Wproj_h
            pl.BlockSpec((1, C), lambda b, qi, h: (0, 0)),                # bproj
        ],
        out_specs=pl.BlockSpec((1, TQ, C), lambda b, qi, h: (b, qi, 0)),
        compiler_params=pltpu.CompilerParams(
            dimension_semantics=("parallel", "parallel", "arbitrary"),
            vmem_limit_bytes=_VMEM_LIMIT),
    )(qh, kh, vh, x, wp3, bproj)

    # ---- glue: (B, L, C) -> NCHW -------------------------------------------
    return jnp.transpose(out, (0, 2, 1)).reshape(B, C, H, W)


# --------------------------------------------------------------------------
# Pure-JAX reference mirroring the PyTorch forward (no cond, no ffn).
# --------------------------------------------------------------------------
def self_attention_ref(x, params, num_heads=8):
    B, C, H, W = x.shape
    L = H * W
    cg = C // NUM_GROUPS
    xr = x.reshape(B, NUM_GROUPS, cg * H * W)
    mean = xr.mean(-1, keepdims=True)
    var = xr.var(-1, keepdims=True)
    xn = ((xr - mean) / jnp.sqrt(var + GN_EPS)).reshape(B, C, H, W)
    xn = xn * params["gamma"][None, :, None, None] + params["beta"][None, :, None, None]
    wqkv = params["wqkv"].reshape(3 * C, C)
    qkv = jnp.einsum("oc,bchw->bohw", wqkv, xn) + params["bqkv"][None, :, None, None]
    qkv = qkv.reshape(B, 3 * C, L)
    q, k, v = jnp.split(qkv, 3, axis=1)
    ch = C // num_heads
    scale = 1.0 / math.sqrt(math.sqrt(ch))
    qh = q.reshape(B * num_heads, ch, L)
    kh = k.reshape(B * num_heads, ch, L)
    vh = v.reshape(B * num_heads, ch, L)
    w = jnp.einsum("bct,bcs->bts", qh * scale, kh * scale)
    w = jax.nn.softmax(w.astype(jnp.float32), axis=-1)
    a = jnp.einsum("bts,bcs->bct", w, vh).reshape(B, C, H, W)
    wproj = params["wproj"].reshape(C, C)
    hproj = jnp.einsum("oc,bchw->bohw", wproj, a) + params["bproj"][None, :, None, None]
    return x + hproj


def make_params(key, channels):
    C = channels
    ks = jax.random.split(key, 6)
    # NOTE: the PyTorch module zero-initializes proj_out (zero_module); small
    # random weights are used so the projection path is actually exercised.
    return {
        "gamma": jax.random.normal(ks[0], (C,), jnp.float32) * 0.1 + 1.0,
        "beta": jax.random.normal(ks[1], (C,), jnp.float32) * 0.1,
        "wqkv": jax.random.normal(ks[2], (3 * C, C, 1, 1), jnp.float32) * 0.05,
        "bqkv": jax.random.normal(ks[3], (3 * C,), jnp.float32) * 0.05,
        "wproj": jax.random.normal(ks[4], (C, C, 1, 1), jnp.float32) * 0.05,
        "bproj": jax.random.normal(ks[5], (C,), jnp.float32) * 0.05,
    }


if __name__ == "__main__":
    key = jax.random.PRNGKey(0)
    kx, kp = jax.random.split(key)

    # C multiple of 32 (GroupNorm), of num_heads, and of 128 (lane-dense).
    B, C, H, W = 2, 128, 16, 16
    num_heads = 8

    x = jax.random.normal(kx, (B, C, H, W), jnp.float32)
    params = make_params(kp, C)

    out = jax.block_until_ready(
        self_attention_pallas(x, params, num_heads=num_heads))
    ref = jax.block_until_ready(
        self_attention_ref(x, params, num_heads=num_heads))

    assert out.shape == (B, C, H, W)
    max_err = float(jnp.max(jnp.abs(out - ref)))
    # bf16 MXU operands + approximate softmax reciprocal -> relaxed tolerance.
    assert jnp.allclose(out, ref, atol=2e-2, rtol=2e-2), max_err

    print("KERNEL_OK")
</pallas_src>

<mosaic_0001>
module attributes {stable_mosaic.version = 11 : i64} {
  func.func @_qkv_kernel(%arg0: i32, %arg1: i32, %arg2: memref<1x256x128xf32, #tpu.memory_space<vmem>>, %arg3: memref<1x1x128xf32, #tpu.memory_space<vmem>>, %arg4: memref<1x1x128xf32, #tpu.memory_space<vmem>>, %arg5: memref<128x384xbf16, #tpu.memory_space<vmem>>, %arg6: memref<1x384xf32, #tpu.memory_space<vmem>>, %arg7: memref<1x256x128xbf16, #tpu.memory_space<vmem>>, %arg8: memref<1x256x128xbf16, #tpu.memory_space<vmem>>, %arg9: memref<1x256x128xbf16, #tpu.memory_space<vmem>>) attributes {dimension_semantics = [#tpu.dimension_semantics<parallel>, #tpu.dimension_semantics<parallel>], iteration_bounds = array<i64: 2, 1>, scalar_prefetch = 0 : i64, scratch_operands = 0 : i64, tpu.core_type = #tpu.core_type<tc>, window_params = [{transform_indices = @transform_0, window_bounds = array<i64: 1, 256, 128>}, {transform_indices = @transform_1, window_bounds = array<i64: 1, 1, 128>}, {transform_indices = @transform_2, window_bounds = array<i64: 1, 1, 128>}, {pipeline_mode = #tpu.pipeline_mode<synchronous>, transform_indices = @transform_3, window_bounds = array<i64: 128, 384>}, {pipeline_mode = #tpu.pipeline_mode<synchronous>, transform_indices = @transform_4, window_bounds = array<i64: 1, 384>}, {transform_indices = @transform_5, window_bounds = array<i64: 1, 256, 128>}, {transform_indices = @transform_6, window_bounds = array<i64: 1, 256, 128>}, {transform_indices = @transform_7, window_bounds = array<i64: 1, 256, 128>}]} {
    %c0 = arith.constant 0 : index
    %c0_0 = arith.constant 0 : index
    %c0_1 = arith.constant 0 : index
    %0 = vector.load %arg2[%c0, %c0_0, %c0_1] : memref<1x256x128xf32, #tpu.memory_space<vmem>>, vector<1x256x128xf32>
    %1 = vector.shape_cast %0 : vector<1x256x128xf32> to vector<256x128xf32>
    %c0_2 = arith.constant 0 : index
    %c0_3 = arith.constant 0 : index
    %c0_4 = arith.constant 0 : index
    %2 = vector.load %arg3[%c0_2, %c0_3, %c0_4] : memref<1x1x128xf32, #tpu.memory_space<vmem>>, vector<1x1x128xf32>
    %3 = vector.shape_cast %2 : vector<1x1x128xf32> to vector<1x128xf32>
    %4 = vector.broadcast %3 : vector<1x128xf32> to vector<256x128xf32>
    %5 = arith.mulf %1, %4 : vector<256x128xf32>
    %c0_5 = arith.constant 0 : index
    %c0_6 = arith.constant 0 : index
    %c0_7 = arith.constant 0 : index
    %6 = vector.load %arg4[%c0_5, %c0_6, %c0_7] : memref<1x1x128xf32, #tpu.memory_space<vmem>>, vector<1x1x128xf32>
    %7 = vector.shape_cast %6 : vector<1x1x128xf32> to vector<1x128xf32>
    %8 = vector.broadcast %7 : vector<1x128xf32> to vector<256x128xf32>
    %9 = arith.addf %5, %8 : vector<256x128xf32>
    %10 = arith.truncf %9 : vector<256x128xf32> to vector<256x128xbf16>
    %c0_8 = arith.constant 0 : index
    %c0_9 = arith.constant 0 : index
    %11 = vector.load %arg5[%c0_8, %c0_9] : memref<128x384xbf16, #tpu.memory_space<vmem>>, vector<128x384xbf16>
    %cst = arith.constant dense<0.000000e+00> : vector<256x384xf32>
    %12 = tpu.matmul %10, %11, %cst {dimension_numbers = #tpu.dot_dimension_numbers<[1], [0], [0], [1], [0, 0, 1, 1], [], []>} : vector<256x128xbf16>, vector<128x384xbf16>, vector<256x384xf32> -> vector<256x384xf32>
    %c0_10 = arith.constant 0 : index
    %c0_11 = arith.constant 0 : index
    %13 = vector.load %arg6[%c0_10, %c0_11] : memref<1x384xf32, #tpu.memory_space<vmem>>, vector<1x384xf32>
    %14 = vector.broadcast %13 : vector<1x384xf32> to vector<256x384xf32>
    %15 = arith.addf %12, %14 : vector<256x384xf32>
    %16 = vector.extract_strided_slice %15 {offsets = [0, 0], sizes = [256, 128], strides = [1, 1]} : vector<256x384xf32> to vector<256x128xf32>
    %17 = arith.truncf %16 : vector<256x128xf32> to vector<256x128xbf16>
    %c0_12 = arith.constant 0 : index
    %c0_13 = arith.constant 0 : index
    %c0_14 = arith.constant 0 : index
    %18 = vector.load %arg7[%c0_12, %c0_13, %c0_14] : memref<1x256x128xbf16, #tpu.memory_space<vmem>>, vector<1x256x128xbf16>
    %19 = vector.shape_cast %18 : vector<1x256x128xbf16> to vector<256x128xbf16>
    %20 = vector.shape_cast %17 : vector<256x128xbf16> to vector<1x256x128xbf16>
    tpu.vector_store %arg7[%c0_12, %c0_13, %c0_14], %20 {strides = array<i32>} : memref<1x256x128xbf16, #tpu.memory_space<vmem>>, vector<1x256x128xbf16>,
    %21 = vector.extract_strided_slice %15 {offsets = [0, 128], sizes = [256, 128], strides = [1, 1]} : vector<256x384xf32> to vector<256x128xf32>
    %22 = arith.truncf %21 : vector<256x128xf32> to vector<256x128xbf16>
    %c0_15 = arith.constant 0 : index
    %c0_16 = arith.constant 0 : index
    %c0_17 = arith.constant 0 : index
    %23 = vector.load %arg8[%c0_15, %c0_16, %c0_17] : memref<1x256x128xbf16, #tpu.memory_space<vmem>>, vector<1x256x128xbf16>
    %24 = vector.shape_cast %23 : vector<1x256x128xbf16> to vector<256x128xbf16>
    %25 = vector.shape_cast %22 : vector<256x128xbf16> to vector<1x256x128xbf16>
    tpu.vector_store %arg8[%c0_15, %c0_16, %c0_17], %25 {strides = array<i32>} : memref<1x256x128xbf16, #tpu.memory_space<vmem>>, vector<1x256x128xbf16>,
    %26 = vector.extract_strided_slice %15 {offsets = [0, 256], sizes = [256, 128], strides = [1, 1]} : vector<256x384xf32> to vector<256x128xf32>
    %27 = arith.truncf %26 : vector<256x128xf32> to vector<256x128xbf16>
    %c0_18 = arith.constant 0 : index
    %c0_19 = arith.constant 0 : index
    %c0_20 = arith.constant 0 : index
    %28 = vector.load %arg9[%c0_18, %c0_19, %c0_20] : memref<1x256x128xbf16, #tpu.memory_space<vmem>>, vector<1x256x128xbf16>
    %29 = vector.shape_cast %28 : vector<1x256x128xbf16> to vector<256x128xbf16>
    %30 = vector.shape_cast %27 : vector<256x128xbf16> to vector<1x256x128xbf16>
    tpu.vector_store %arg9[%c0_18, %c0_19, %c0_20], %30 {strides = array<i32>} : memref<1x256x128xbf16, #tpu.memory_space<vmem>>, vector<1x256x128xbf16>,
    return
  }
  func.func @transform_0(%arg0: i32, %arg1: i32) -> (i32, i32, i32) {
    %c0_i32 = arith.constant 0 : i32
    %c0_i32_0 = arith.constant 0 : i32
    return %arg0, %arg1, %c0_i32 : i32, i32, i32
  }
  func.func @transform_1(%arg0: i32, %arg1: i32) -> (i32, i32, i32) {
    %c0_i32 = arith.constant 0 : i32
    %c0_i32_0 = arith.constant 0 : i32
    %c0_i32_1 = arith.constant 0 : i32
    return %arg0, %c0_i32, %c0_i32_0 : i32, i32, i32
  }
  func.func @transform_2(%arg0: i32, %arg1: i32) -> (i32, i32, i32) {
    %c0_i32 = arith.constant 0 : i32
    %c0_i32_0 = arith.constant 0 : i32
    %c0_i32_1 = arith.constant 0 : i32
    return %arg0, %c0_i32, %c0_i32_0 : i32, i32, i32
  }
  func.func @transform_3(%arg0: i32, %arg1: i32) -> (i32, i32) {
    %c0_i32 = arith.constant 0 : i32
    %c0_i32_0 = arith.constant 0 : i32
    %c0_i32_1 = arith.constant 0 : i32
    return %c0_i32, %c0_i32_0 : i32, i32
  }
  func.func @transform_4(%arg0: i32, %arg1: i32) -> (i32, i32) {
    %c0_i32 = arith.constant 0 : i32
    %c0_i32_0 = arith.constant 0 : i32
    %c0_i32_1 = arith.constant 0 : i32
    return %c0_i32, %c0_i32_0 : i32, i32
  }
  func.func @transform_5(%arg0: i32, %arg1: i32) -> (i32, i32, i32) {
    %c0_i32 = arith.constant 0 : i32
    %c0_i32_0 = arith.constant 0 : i32
    return %arg0, %arg1, %c0_i32 : i32, i32, i32
  }
  func.func @transform_6(%arg0: i32, %arg1: i32) -> (i32, i32, i32) {
    %c0_i32 = arith.constant 0 : i32
    %c0_i32_0 = arith.constant 0 : i32
    return %arg0, %arg1, %c0_i32 : i32, i32, i32
  }
  func.func @transform_7(%arg0: i32, %arg1: i32) -> (i32, i32, i32) {
    %c0_i32 = arith.constant 0 : i32
    %c0_i32_0 = arith.constant 0 : i32
    return %arg0, %arg1, %c0_i32 : i32, i32, i32
  }
}

</mosaic_0001>

<bundles_post_ra>
// kernel: tpu_custom_call.1
= control target key start
LH: loop header
LB: loop body
LE: loop exit
PB: predicated region body
PF: predicated region fallthrough
CT: control target
= control target key end

     0   :  { %s3401_s0 = inlined_call_operand.hbm [shape: f32[2,256,128], index: 0, kind: input, shape index: {}]   ;;  %s3402_s1 = inlined_call_operand.vmem [shape: f32[2,1,128], index: 1, kind: input, shape index: {}]   ;;  %s3403_s2 = inlined_call_operand.vmem [shape: f32[2,1,128], index: 2, kind: input, shape index: {}]   ;;  %s3404_s3 = inlined_call_operand.hbm [shape: bf16[128,384], index: 3, kind: input, shape index: {}]   ;;  %s3405_s4 = inlined_call_operand.vmem [shape: f32[1,384], index: 4, kind: input, shape index: {}]   ;;  %s3406_s5 = inlined_call_operand.hbm [shape: bf16[2,256,128], index: 5, kind: output, shape index: {0}]   ;;  %s3407_s6 = inlined_call_operand.hbm [shape: bf16[2,256,128], index: 6, kind: output, shape index: {1}]   ;;  %s3408_s7 = inlined_call_operand.hbm [shape: bf16[2,256,128], index: 7, kind: output, shape index: {2}]  }
   0x1   :  { %3413 = sst [smem:[#allocation15_spill]] %s3401_s0 }
   0x2   :  { %3414 = sst [smem:[#allocation16_spill]] %s3402_s1 }
   0x3   :  { %3415 = sst [smem:[#allocation17_spill]] %s3403_s2 }
   0x4   :  { %3416 = sst [smem:[#allocation18_spill]] %s3404_s3 }
   0x5   :  { %13 = vsyncpa [#allocation3], 0 }
   0x6   :  { %15 = vsyncpa [#allocation3 + $0x1], 0 }
   0x7   :  { %16 = vsyncpa [#allocation6], 0 }
   0x8   :  { %17 = vsyncpa [#allocation4], 0 }
   0x9   :  { %19 = vsyncpa [#allocation4 + $0x1], 0 }
   0xa   :  { %20 = vsyncpa [#allocation9], 0 }
   0xb   :  { %22 = vsyncpa [#allocation9 + $0x1], 0  ;;  %s2766_s24 = smov 0   ;;  %s2768_s25 = smov 0  }
   0xc   :  { %s2770_s26 = smov 0   ;;  %s2772_s27 = smov 0  }
   0xd   :  { %s2774_s28 = smov 0   ;;  %s2776_s29 = smov 0  }
   0xe LB: > { %s2797_s30 = sadd.s32 4294967295, %s2712_s29   ;;  %s3412_s8 = sadd.s32 4294967294, %s2712_s29   ;;  %s2712_s29 = sphi %s2776_s29, %s28_s29   ;;  %s2708_s28 = sphi %s2774_s28, %s3441_s28   ;;  %s2704_s27 = sphi %s2772_s27, %s3440_s27   ;;  %s2700_s26 = sphi %s2770_s26, %s3439_s26   ;;  %s2696_s25 = sphi %s2768_s25, %s3438_s25   ;;  %s2692_s24 = sphi %s2766_s24, %s3437_s24  }
   0xf   : > { %p62_p0 = scmp.ne.s32.totalorder %s2696_s25, %s2692_s24  ;;  %p3409_p1 = scmp.eq.s32.totalorder %s2797_s30, 0 }
  0x10   : > { %p188_p3 = scmp.eq.s32.totalorder %s3412_s8, 1  ;;  %p1768_p5 = scmp.ge.s32.totalorder %s2712_s29, 1 }
  0x11   : > { %p2808_p4 = por %p3409_p1, %p62_p0  ;;  %p251_p7 = scmp.lt.s32.totalorder %s2712_s29, 3 }
  0x12   : > { %p2813_p6 = por %p188_p3, %p62_p0  ;;  %s2714_s12 = smov [#allocation5]  }
  0x13   : > { %s3417_s9 = scalar_select %p2808_p4, 1, 0 }
  0x14   : > { %s3418_s10 = scalar_select %p2813_p6, 1, 0 }
  0x15   : > { %p2818_p8 = pnand %p1768_p5, %p251_p7  ;;  %s263_s13 = sshll.u32 %s2714_s12, 4  ;;  %s264_s13 = int_to_ptr.vmem [resolvable:$true] %s263_s13 }
  0x16   : > { %s40_s15 = sadd.s32 1, %s2708_s28  ;;  %s3421_s3 = sld [smem:[#allocation18_spill]] }
  0x17   : > { %s3419_s11 = scalar_select %p2818_p8, 1, 0 }
  0x18   : > { %p2398_p9 = pneg %p2818_p8 }
  0x1a   : > { %p2827_p11 = pnand %p2398_p9, %p3409_p1 }
  0x1c   : > { %s2508_s18 = scalar_lea.hbm %s3421_s3, 3072  ;;  %p2510_p13 = pneg %p2827_p11 }
  0x1d   : > { %p2509_p12 = scmp.ne.s32.totalorder %s3421_s3, %s2508_s18  ;;  %p2515_p5 = scmp.lt.u32.totalorder %s2508_s18, %s3421_s3 }
  0x1f   : > { %p2511_p0 = pnand %p2510_p13, %p2509_p12 }
  0x21   : > { %p2512_p3 = pneg %p2511_p0 }
  0x23   : > { %p2517_p7 = pnand %p2515_p5, %p2512_p3 }
  0x25   : > { %2520 = shalt.err (!%p2517_p7)
}
  0x26   : > { %s2521_s23 = scalar_lea.vmem %s264_s13, 3072  ;;  %p2529_p2 = scmp.lt.s32.totalorder %s264_s13, %s264_s13 }
  0x27   : > { %p2522_p9 = scmp.ne.s32.totalorder %s264_s13, %s2521_s23  ;;  %p2530_p6 = scmp.lt.s32.totalorder %s2521_s23, %s2521_s23 }
  0x29   : > { %p2524_p10 = pnand %p2522_p9, %p2510_p13  ;;  %p2531_p4 = por %p2530_p6, %p2529_p2 }
  0x2b   : > { %p2525_p1 = pneg %p2524_p10 }
  0x2d   : > { %p2532_p8 = pnand %p2531_p4, %p2525_p1 }
  0x2f   : > { %2535 = shalt.err (!%p2532_p8)
}
  0x30   : > { %s2715_s12 = smov 192   ;;  %s2716_s16 = smov 12  }
  0x31   : > { %2401 = dma.hbm_to_vmem [thread:$0]  (!%p2827_p11), %s3421_s3, 3072, %s264_s13, [#allocation6], %s2715_s12, %s2715_s12, %s2716_s16  }
  0x32   : > { %p42_p1 = scmp.ge.s32.totalorder %s40_s15, 2  ;;  %s49_s19 = sadd.s32 1, %s2700_s26 }
  0x33   : > { %p56_p2 = scmp.ne.s32.totalorder %s2700_s26, %s2696_s25  ;;  %p57_p4 = scmp.eq.s32.totalorder %s2712_s29, 0 }
  0x34   : > { %s3443_s15 = smov (%p42_p1, %s40_s15), 0  ;;  %p3423_p8 = scmp.eq.s32.totalorder %s2797_s30, 1 }
  0x35   : > { %p2854_p6 = por %p57_p4, %p56_p2  ;;  %s44_s14 = ssub.s32 %s2708_s28, %s3443_s15 }
  0x36   : > { %p2860_p10 = por %p3423_p8, %p56_p2  ;;  %p2417_p12 = scmp.lt.s32.totalorder %s2712_s29, 2 }
  0x37   : > { %p47_p11 = scmp.eq.s32.totalorder %s44_s14, 0  ;;  %s280_s13 = sand.u32 1, %s2700_s26  }
  0x38   : > { %s1771_s22 = sshll.u32 %s280_s13, 8  ;;  %s1913_s12 = sshll.u32 %s2708_s28, 12 }
  0x39   : > { %s2869_s23 = scalar_select %p47_p11, %s2700_s26, %s49_s19  }
  0x3a   : > { %s3425_s0 = sld [smem:[#allocation15_spill]]  ;;  %s284_s8 = scalar_lea.vmem [#allocation2], %s1771_s22 }
  0x3b   : > { %s293_s3 = sshll.u32 %s284_s8, 4  ;;  %p2881_p13 = pnand %p2417_p12, %p2854_p6  ;;  %s2877_s3 = int_to_ptr.vmem [resolvable:$true] %s293_s3 }
  0x3c   : > { %s2885_s19 = scalar_lea.sflag [#allocation3], %s280_s13 }
  0x3d   : > { %p2538_p3 = pneg %p2881_p13 }
  0x40   : > { %s2875_s18 = scalar_lea.hbm %s3425_s0, %s1913_s12  ;;  %s2541_s20 = scalar_lea.hbm %s3425_s0, 8192 }
  0x41   : > { %s2536_s16 = scalar_lea.hbm %s2875_s18, 4096  ;;  %p2542_p9 = scmp.lt.u32.totalorder %s2875_s18, %s3425_s0 }
  0x42   : > { %p2537_p0 = scmp.ne.s32.totalorder %s2875_s18, %s2536_s16  ;;  %p2543_p1 = scmp.lt.u32.totalorder %s2541_s20, %s2536_s16 }
  0x43   : > { %p2545_p4 = scmp.lt.u32.totalorder %s2536_s16, %s2875_s18 }
  0x44   : > { %p2539_p5 = pnand %p2538_p3, %p2537_p0  ;;  %p2544_p2 = por %p2543_p1, %p2542_p9 }
  0x46   : > { %p2540_p7 = pneg %p2539_p5  ;;  %p2546_p6 = por %p2545_p4, %p2544_p2 }
  0x48   : > { %p2547_p8 = pnand %p2546_p6, %p2540_p7 }
  0x4a   : > { %2550 = shalt.err (!%p2547_p8)
}
  0x4b   : > { %s2551_s13 = scalar_lea.vmem %s2877_s3, 4096  ;;  %s2717_s8 = smov [#allocation2]  }
  0x4c   : > { %p2552_p12 = scmp.ne.s32.totalorder %s2877_s3, %s2551_s13  ;;  %s2556_s22 = sshll.u32 %s2717_s8, 4  ;;  %s2557_s22 = int_to_ptr.vmem [resolvable:$false] %s2556_s22 }
  0x4d   : > { %s2558_s12 = scalar_lea.vmem %s2557_s22, 8192  ;;  %p2559_p5 = scmp.lt.s32.totalorder %s2877_s3, %s2557_s22 }
  0x4e   : > { %p2554_p11 = pnand %p2552_p12, %p2538_p3  ;;  %p2560_p9 = scmp.lt.s32.totalorder %s2558_s12, %s2551_s13 }
  0x50   : > { %p2555_p0 = pneg %p2554_p11  ;;  %p2561_p1 = por %p2560_p9, %p2559_p5 }
  0x52   : > { %p2562_p2 = pnand %p2561_p1, %p2555_p0 }
  0x54   : > { %2565 = shalt.err (!%p2562_p2)
}
  0x55   : > { %s2718_s16 = smov 128   ;;  %s2719_s20 = smov 8  }
  0x56   : > { %2405 = dma.hbm_to_vmem [thread:$0]  (!%p2881_p13), %s2875_s18, 4096, %s2877_s3, %s2885_s19, %s2718_s16, %s2718_s16, %s2719_s20  }
  0x57   : > { %p3427_p3 = scmp.ne.s32.totalorder %s3419_s11, 0 }
  0x58   : > { %s2916_s17 = sand.u32 (!%p3427_p3), 1, %s2696_s25   ;;  %p3428_p7 = scmp.ne.s32.totalorder (!%p3427_p3), %s3417_s9, 0 }
  0x59   : > { %317 = sbr.rel (%p3427_p3) target bundleno = 507 (0x1fb), region = 40  ;;  %s1775_s13 = sshll.u32 (!%p3427_p3), %s2916_s17, 8 }
  0x5a   : > { %s320_s8 = scalar_lea.sflag (!%p3427_p3), [#allocation3], %s2916_s17  ;;  %s2920_s22 = scalar_lea.vmem (!%p3427_p3), [#allocation2], %s1775_s13 }
  0x60   : > { %2675 = dma.done.wait (%p3428_p7), %s320_s8, 4096  }
  0x61   : > { %2677 = vsyncadd (%p3428_p7), %s320_s8, 4294963200  ;;  %p3429_p13 = scmp.eq.s32.totalorder %s2797_s30, 0 }
  0x63   : > { %2679 = dma.done.wait (%p3429_p13), [#allocation6], 3072   ;;  %p3430_p4 = pmov %p3429_p13 }
  0x64   : > { %v2720_v0 = vmov 0   ;;  %v2476_v1 = vld [vmem:[#allocation5 + $0x4] ss:$12 sps:$4 sm:$0xff]   ;;  %v2478_v2 = vld [vmem:[#allocation5] ss:$12 sps:$4 sm:$0xff]   ;;  %p375_p6 = scmp.lt.s32.totalorder %s2704_s27, 1 }
  0x65   : > { %2681 = vsyncadd (%p3430_p4), [#allocation6], 4294964224  ;;  %720 = vmatprep.mubr.bf16.mxu0 %v2720_v0  ;;  %840 = vmatprep.mubr.bf16.mxu1 %v2720_v0  ;;  %v2479_v3 = vld [vmem:[#allocation5 + $0x1c] ss:$12 sps:$4 sm:$0xff]   ;;  %v2481_v4 = vld [vmem:[#allocation5 + $0x18] ss:$12 sps:$4 sm:$0xff]  }
  0x66   : > { %688 = vmatprep.subr.bf16.mxu0 %v2476_v1  ;;  %2370 = vmatprep.subr.bf16.mxu1 %v2476_v1  ;;  %v2482_v5 = vld [vmem:[#allocation5 + $0x34] ss:$12 sps:$4 sm:$0xff]   ;;  %v2484_v6 = vld [vmem:[#allocation5 + $0x30] ss:$12 sps:$4 sm:$0xff]   ;;  %v2485_v7 = vld [vmem:[#allocation5 + $0x4c] ss:$12 sps:$4 sm:$0xff]  }
  0x67   : > { %689 = vmatpush1.bf16.msra.mxu0 %v2478_v2  ;;  %2378 = vmatpush1.bf16.msra.mxu1 %v2478_v2  ;;  %v2487_v8 = vld [vmem:[#allocation5 + $0x48] ss:$12 sps:$4 sm:$0xff]   ;;  %s2934_s3 = scalar_select %p375_p6, %s2704_s27, 1  ;;  %v2488_v9 = vld [vmem:[#allocation5 + $0x64] ss:$12 sps:$4 sm:$0xff]   ;;  %v388_v31 = vld [vmem:[%s2920_s22 + $0x18] sm:$0xff] }
  0x68   : > { %690 = vmatprep.subr.bf16.mxu0 %v2479_v3  ;;  %2371 = vmatprep.subr.bf16.mxu1 %v2479_v3  ;;  %v2490_v10 = vld [vmem:[#allocation5 + $0x60] ss:$12 sps:$4 sm:$0xff]   ;;  %s3431_s1 = sld [smem:[#allocation16_spill]]  ;;  %v2491_v11 = vld [vmem:[#allocation5 + $0x7c] ss:$12 sps:$4 sm:$0xff]   ;;  %s3432_s2 = sld [smem:[#allocation17_spill]] }
  0x69   : > { %v2493_v12 = vld [vmem:[#allocation5 + $0x78] ss:$12 sps:$4 sm:$0xff]   ;;  %v386_v14 = vld [vmem:[%s2920_s22 + $0x8] sm:$0xff]  ;;  %v2494_v18 = vld [vmem:[#allocation5 + $0x94] ss:$12 sps:$4 sm:$0xff]   ;;  %s3111_s13 = sshll.u32 %s2916_s17, 7 }
  0x6a   : > { %v385_v13 = vld [vmem:[%s2920_s22] sm:$0xff]  ;;  %v410_v17 = vld [vmem:[%s2920_s22 + $0xc8] sm:$0xff]  ;;  %v2496_v19 = vld [vmem:[#allocation5 + $0x90] ss:$12 sps:$4 sm:$0xff]   ;;  %s3121_s8 = scalar_lea.vmem [#allocation7], %s3111_s13  ;;  %s2010_s11 = sshll.u32 %s2704_s27, 11 }
  0x6b   : > { %691 = vmatpush1.bf16.msra.mxu0 %v2481_v4  ;;  %2379 = vmatpush1.bf16.msra.mxu1 %v2481_v4  ;;  %v409_v16 = vld [vmem:[%s2920_s22 + $0xc0] sm:$0xff]  ;;  %v2497_v25 = vld [vmem:[#allocation5 + $0xac] ss:$12 sps:$4 sm:$0xff]   ;;  %v387_v26 = vld [vmem:[%s2920_s22 + $0x10] sm:$0xff]  ;;  %s3273_s16 = scalar_lea.hbm %s3406_s5, %s2010_s11  ;;  %s3280_s9 = scalar_lea.hbm %s3407_s6, %s2010_s11 }
  0x6c   : > { %692 = vmatprep.subr.bf16.mxu0 %v2482_v5  ;;  %2372 = vmatprep.subr.bf16.mxu1 %v2482_v5  ;;  %v411_v32 = vld [vmem:[%s2920_s22 + $0xd0] sm:$0xff]  ;;  %v412_v34 = vld [vmem:[%s2920_s22 + $0xd8] sm:$0xff]  ;;  %v405_v44 = vld [vmem:[%s2920_s22 + $0xa0] sm:$0xff]  ;;  %s3289_s0 = scalar_lea.hbm %s3408_s7, %s2010_s11  ;;  %s2721_s20 = smov [#allocation7]  }
  0x6d   : > { %v2499_v33 = vld [vmem:[#allocation5 + $0xa8] ss:$12 sps:$4 sm:$0xff]   ;;  %v404_v40 = vld [vmem:[%s2920_s22 + $0x98] sm:$0xff]  ;;  %v2501_v46 = vld [vmem:[#allocation5 + $0x20] ss:$12 sps:$4 sm:$0xff]  }
  0x6e   : > { %s377_s18 = scalar_lea.vmem %s3431_s1, %s2934_s3  ;;  %s380_s12 = scalar_lea.vmem %s3432_s2, %s2934_s3  ;;  %v2500_v35 = vld [vmem:[#allocation5 + $0x8] ss:$12 sps:$4 sm:$0xff]   ;;  %v389_v53 = vld [vmem:[%s2920_s22 + $0x20] sm:$0xff]  ;;  %v408_v56 = vld [vmem:[%s2920_s22 + $0xb8] sm:$0xff] }
  0x6f   : > { %693 = vmatpush1.bf16.msra.mxu0 %v2484_v6  ;;  %2380 = vmatpush1.bf16.msra.mxu1 %v2484_v6  ;;  %v2942_v15 = vld [vmem:[%s377_s18] ss:$0 sm:$0xff]  ;;  %v403_v39 = vld [vmem:[%s2920_s22 + $0x90] sm:$0xff]  ;;  %v406_v45 = vld [vmem:[%s2920_s22 + $0xa8] sm:$0xff]  ;;  %s3180_s3 = scalar_lea.vmem [#allocation10], %s3111_s13  ;;  %s1548_s18 = sshll.u32 %s3121_s8, 4  ;;  %s3275_s18 = int_to_ptr.vmem [resolvable:$true] %s1548_s18 }
  0x70   : > { %694 = vmatprep.subr.bf16.mxu0 %v2485_v7  ;;  %2373 = vmatprep.subr.bf16.mxu1 %v2485_v7  ;;  %v424_v20 = vmul.f32 %v2942_v15, %v385_v13  ;;  %v425_v21 = vmul.f32 %v2942_v15, %v386_v14  ;;  %v448_v22 = vmul.f32 %v2942_v15, %v409_v16  ;;  %v2954_v24 = vld [vmem:[%s380_s12] ss:$0 sm:$0xff]  ;;  %v407_v50 = vld [vmem:[%s2920_s22 + $0xb0] sm:$0xff]  ;;  %v390_v58 = vld [vmem:[%s2920_s22 + $0x28] sm:$0xff]  ;;  %s1584_s27 = sshll.u32 %s3180_s3, 4  ;;  %s1523_s1 = scalar_lea.sflag [#allocation4], %s2916_s17  ;;  %s3291_s27 = int_to_ptr.vmem [resolvable:$true] %s1584_s27 }
  0x71   : > { %v449_v23 = vmul.f32 %v2942_v15, %v410_v17  ;;  %v426_v36 = vmul.f32 %v2942_v15, %v387_v26  ;;  %v427_v37 = vmul.f32 %v2942_v15, %v388_v31  ;;  %v450_v38 = vmul.f32 %v2942_v15, %v411_v32  ;;  %v413_v61 = vld [vmem:[%s2920_s22 + $0xe0] sm:$0xff]  ;;  %v414_v62 = vld [vmem:[%s2920_s22 + $0xe8] sm:$0xff]  ;;  %v2503_v16 = vld [vmem:[#allocation5 + $0x50] ss:$12 sps:$4 sm:$0xff]   ;;  %s2566_s2 = scalar_lea.vmem %s3275_s18, 2048 }
  0x72   : > { %v463_v27 = vadd.f32 %v2954_v24, %v424_v20  ;;  %v464_v28 = vadd.f32 %v2954_v24, %v425_v21  ;;  %v487_v29 = vadd.f32 %v2954_v24, %v448_v22  ;;  %v451_v43 = vmul.f32 %v2942_v15, %v412_v34  ;;  %v2502_v3 = vld [vmem:[#allocation5 + $0x38] ss:$12 sps:$4 sm:$0xff]   ;;  %v391_v22 = vld [vmem:[%s2920_s22 + $0x30] sm:$0xff]  ;;  %v2505_v34 = vld [vmem:[#allocation5 + $0x80] ss:$12 sps:$4 sm:$0xff]   ;;  %p2567_p8 = scmp.ne.s32.totalorder %s3275_s18, %s2566_s2 }
  0x73   : > { %695 = vmatpush1.bf16.msra.mxu0 %v2487_v8  ;;  %2381 = vmatpush1.bf16.msra.mxu1 %v2487_v8  ;;  %v488_v30 = vadd.f32 %v2954_v24, %v449_v23  ;;  %v465_v47 = vadd.f32 %v2954_v24, %v426_v36  ;;  %v442_v48 = vmul.f32 %v2942_v15, %v403_v39  ;;  %v392_v23 = vld [vmem:[%s2920_s22 + $0x38] sm:$0xff]  ;;  %v393_v39 = vld [vmem:[%s2920_s22 + $0x40] sm:$0xff] }
  0x74   : > { %696 = vmatprep.subr.bf16.mxu0 %v2488_v9  ;;  %2374 = vmatprep.subr.bf16.mxu1 %v2488_v9  ;;  %v2969_v41 = vpack.c.bf16 %v464_v28, %v463_v27  ;;  %v443_v49 = vmul.f32 %v2942_v15, %v404_v40  ;;  %v466_v51 = vadd.f32 %v2954_v24, %v427_v37  ;;  %v416_v26 = vld [vmem:[%s2920_s22 + $0xf8] sm:$0xff]  ;;  %v2504_v27 = vld [vmem:[#allocation5 + $0x68] ss:$12 sps:$4 sm:$0xff]   ;;  %p2568_p12 = pnand %p2567_p8, %p2860_p10 }
  0x75   : > { %v2971_v42 = vpack.c.bf16 %v488_v30, %v487_v29  ;;  %v489_v52 = vadd.f32 %v2954_v24, %v450_v38  ;;  %v444_v54 = vmul.f32 %v2942_v15, %v405_v44  ;;  %v445_v55 = vmul.f32 %v2942_v15, %v406_v45  ;;  %v394_v40 = vld [vmem:[%s2920_s22 + $0x48] sm:$0xff] }
  0x76   : > { %v490_v57 = vadd.f32 %v2954_v24, %v451_v43  ;;  %v481_v59 = vadd.f32 %v2954_v24, %v442_v48  ;;  %v482_v60 = vadd.f32 %v2954_v24, %v443_v49  ;;  %v446_v2 = vmul.f32 %v2942_v15, %v407_v50  ;;  %v2506_v43 = vld [vmem:[#allocation5 + $0x98] ss:$12 sps:$4 sm:$0xff]   ;;  %v2507_v48 = vld [vmem:[#allocation5 + $0xb0] ss:$12 sps:$4 sm:$0xff]   ;;  %p2569_p11 = pneg %p2568_p12 }
  0x77   : > { %697 = vmatpush1.bf16.msra.mxu0 %v2490_v10  ;;  %2382 = vmatpush1.bf16.msra.mxu1 %v2490_v10  ;;  %v483_v63 = vadd.f32 %v2954_v24, %v444_v54  ;;  %v484_v1 = vadd.f32 %v2954_v24, %v445_v55  ;;  %v428_v4 = vmul.f32 %v2942_v15, %v389_v53 }
  0x78   : > { %698 = vmatprep.subr.bf16.mxu0 %v2491_v11  ;;  %2375 = vmatprep.subr.bf16.mxu1 %v2491_v11  ;;  %v3000_v5 = vpack.c.bf16 %v482_v60, %v481_v59  ;;  %v447_v6 = vmul.f32 %v2942_v15, %v408_v56  ;;  %v3003_v7 = vpack.c.bf16 %v466_v51, %v465_v47  ;;  %v395_v51 = vld [vmem:[%s2920_s22 + $0x50] sm:$0xff] }
  0x79   : > { %v429_v8 = vmul.f32 %v2942_v15, %v390_v58  ;;  %v3006_v9 = vpack.c.bf16 %v484_v1, %v483_v63  ;;  %v485_v10 = vadd.f32 %v2954_v24, %v446_v2  ;;  %v3009_v11 = vpack.c.bf16 %v490_v57, %v489_v52  ;;  %v396_v52 = vld [vmem:[%s2920_s22 + $0x58] sm:$0xff]  ;;  %v398_v58 = vld [vmem:[%s2920_s22 + $0x68] sm:$0xff]  ;;  %v399_v1 = vld [vmem:[%s2920_s22 + $0x70] sm:$0xff] }
  0x7a   : > { %v453_v13 = vmul.f32 %v2942_v15, %v414_v62  ;;  %v486_v14 = vadd.f32 %v2954_v24, %v447_v6  ;;  %v430_v28 = vmul.f32 %v2942_v15, %v391_v22  ;;  %v431_v29 = vmul.f32 %v2942_v15, %v392_v23  ;;  %v400_v2 = vld [vmem:[%s2920_s22 + $0x78] sm:$0xff] }
  0x7b   : > { %699 = vmatpush1.bf16.msra.mxu0 %v2493_v12  ;;  %2383 = vmatpush1.bf16.msra.mxu1 %v2493_v12  ;;  %v452_v12 = vmul.f32 %v2942_v15, %v413_v61  ;;  %v433_v47 = vmul.f32 %v2942_v15, %v394_v40  ;;  %v434_v54 = vmul.f32 %v2942_v15, %v395_v51 }
  0x7c   : > { %700 = vmatprep.subr.bf16.mxu0 %v2494_v18  ;;  %2376 = vmatprep.subr.bf16.mxu1 %v2494_v18  ;;  %v3014_v17 = vpack.c.bf16 %v486_v14, %v485_v10  ;;  %v467_v18 = vadd.f32 %v2954_v24, %v428_v4  ;;  %v492_v21 = vadd.f32 %v2954_v24, %v453_v13  ;;  %v402_v4 = vld [vmem:[%s2920_s22 + $0x88] sm:$0xff] }
  0x7d   : > { %v491_v20 = vadd.f32 %v2954_v24, %v452_v12  ;;  %v470_v36 = vadd.f32 %v2954_v24, %v431_v29  ;;  %v472_v50 = vadd.f32 %v2954_v24, %v433_v47  ;;  %v435_v55 = vmul.f32 %v2942_v15, %v396_v52 }
  0x7e   : > { %v473_v56 = vadd.f32 %v2954_v24, %v434_v54  ;;  %v437_v61 = vmul.f32 %v2942_v15, %v398_v58  ;;  %v441_v12 = vmul.f32 %v2942_v15, %v402_v4 }
  0x7f   : > { %701 = vmatpush1.bf16.msra.mxu0 %v2496_v19  ;;  %2384 = vmatpush1.bf16.msra.mxu1 %v2496_v19  ;;  %v468_v19 = vadd.f32 %v2954_v24, %v429_v8  ;;  %v3030_v31 = vpack.c.bf16 %v492_v21, %v491_v20  ;;  %v474_v57 = vadd.f32 %v2954_v24, %v435_v55 }
  0x80   : > { %702 = vmatprep.subr.bf16.mxu0 %v2497_v25  ;;  %2377 = vmatprep.subr.bf16.mxu1 %v2497_v25  ;;  %v415_v25 = vld [vmem:[%s2920_s22 + $0xf0] sm:$0xff]  ;;  %v476_v63 = vadd.f32 %v2954_v24, %v437_v61  ;;  %v439_v8 = vmul.f32 %v2942_v15, %v400_v2 }
  0x81   : > { %v497_v30 = vpack.c.bf16 %v468_v19, %v467_v18  ;;  %v454_v32 = vmul.f32 %v2942_v15, %v415_v25  ;;  %v500_v59 = vpack.c.bf16 %v474_v57, %v473_v56  ;;  %v480_v18 = vadd.f32 %v2954_v24, %v441_v12 }
  0x82   : > { %v478_v14 = vadd.f32 %v2954_v24, %v439_v8 }
  0x83   : > { %703 = vmatpush1.bf16.msra.mxu0 %v2499_v33  ;;  %2385 = vmatpush1.bf16.msra.mxu1 %v2499_v33  ;;  %v455_v33 = vmul.f32 %v2942_v15, %v416_v26  ;;  %v493_v37 = vadd.f32 %v2954_v24, %v454_v32 }
  0x84   : > { %2322 = vmatprep.subr.bf16.mxu1 %v2500_v35 }
  0x85   : > { %v494_v38 = vadd.f32 %v2954_v24, %v455_v33 }
  0x86   : > { %721 = vmatmul.mubr.bf16.vlgmr.msra.gmra.mrb[0].mxu0 %v2969_v41  ;;  %841 = vmatmul.mubr.bf16.vlgmr.msra.gmra.mrb[0].mxu1 %v2971_v42 }
  0x87   : > { %2323 = vmatpush3.bf16.msra.mxu1 %v2500_v35  ;;  %730 = vmatprep.mubr.bf16.mxu0 %v2720_v0  ;;  %v469_v35 = vadd.f32 %v2954_v24, %v430_v28  ;;  %v3043_v45 = vpack.c.bf16 %v494_v38, %v493_v37 }
  0x88   : > { %2324 = vmatprep.subr.bf16.mxu1 %v2501_v46  ;;  %850 = vmatprep.mubr.bf16.mxu1 %v2720_v0 }
  0x89   : > { %v498_v44 = vpack.c.bf16 %v470_v36, %v469_v35 }
  0x8b   : > { %2325 = vmatpush3.bf16.msra.mxu1 %v2501_v46  ;;  %v432_v46 = vmul.f32 %v2942_v15, %v393_v39 }
  0x8c   : > { %2326 = vmatprep.subr.bf16.mxu1 %v2502_v3 }
  0x8d   : > { %v471_v49 = vadd.f32 %v2954_v24, %v432_v46 }
  0x8e   : > { %731 = vmatmul.mubr.bf16.gmra.mrb[4].mxu0 %v3003_v7  ;;  %851 = vmatmul.mubr.bf16.gmra.mrb[4].mxu1 %v3009_v11 }
  0x8f   : > { %2327 = vmatpush3.bf16.msra.mxu1 %v2502_v3  ;;  %740 = vmatprep.mubr.bf16.mxu0 %v2720_v0  ;;  %v499_v53 = vpack.c.bf16 %v472_v50, %v471_v49  ;;  %v401_v3 = vld [vmem:[%s2920_s22 + $0x80] sm:$0xff] }
  0x90   : > { %2328 = vmatprep.subr.bf16.mxu1 %v2503_v16  ;;  %860 = vmatprep.mubr.bf16.mxu1 %v2720_v0  ;;  %v440_v10 = vmul.f32 %v2942_v15, %v401_v3 }
  0x93   : > { %2329 = vmatpush3.bf16.msra.mxu1 %v2503_v16  ;;  %v479_v16 = vadd.f32 %v2954_v24, %v440_v10 }
  0x94   : > { %2330 = vmatprep.subr.bf16.mxu1 %v2504_v27 }
  0x95   : > { %v503_v20 = vpack.c.bf16 %v480_v18, %v479_v16 }
  0x96   : > { %741 = vmatmul.mubr.bf16.gmra.mrb[8].mxu0 %v497_v30  ;;  %861 = vmatmul.mubr.bf16.gmra.mrb[8].mxu1 %v3030_v31 }
  0x97   : > { %2331 = vmatpush3.bf16.msra.mxu1 %v2504_v27  ;;  %750 = vmatprep.mubr.bf16.mxu0 %v2720_v0 }
  0x98   : > { %2332 = vmatprep.subr.bf16.mxu1 %v2505_v34  ;;  %870 = vmatprep.mubr.bf16.mxu1 %v2720_v0 }
  0x9b   : > { %2333 = vmatpush3.bf16.msra.mxu1 %v2505_v34 }
  0x9c   : > { %2334 = vmatprep.subr.bf16.mxu1 %v2506_v43 }
  0x9e   : > { %751 = vmatmul.mubr.bf16.gmra.mrb[12].mxu0 %v498_v44  ;;  %871 = vmatmul.mubr.bf16.gmra.mrb[12].mxu1 %v3043_v45 }
  0x9f   : > { %2335 = vmatpush3.bf16.msra.mxu1 %v2506_v43  ;;  %760 = vmatprep.mubr.bf16.mxu0 %v2720_v0 }
  0xa0   : > { %2336 = vmatprep.subr.bf16.mxu1 %v2507_v48  ;;  %2338 = vmatprep.mubr.bf16.mxu1 %v2969_v41  ;;  %v397_v41 = vld [vmem:[%s2920_s22 + $0x60] sm:$0xff]  ;;  %s3126_s22 = scalar_lea.vmem [#allocation8], %s3111_s13  ;;  %s2570_s13 = sshll.u32 %s2721_s20, 4  ;;  %s2571_s13 = int_to_ptr.vmem [resolvable:$false] %s2570_s13 }
  0xa1   : > { %v436_v60 = vmul.f32 %v2942_v15, %v397_v41  ;;  %s1566_s14 = sshll.u32 %s3126_s22, 4  ;;  %p2573_p0 = scmp.lt.s32.totalorder %s3275_s18, %s2571_s13  ;;  %s3282_s14 = int_to_ptr.vmem [resolvable:$true] %s1566_s14 }
  0xa3   : > { %2337 = vmatpush3.bf16.msra.mxu1 %v2507_v48  ;;  %v475_v62 = vadd.f32 %v2954_v24, %v436_v60 }
  0xa5   : > { %v501_v6 = vpack.c.bf16 %v476_v63, %v475_v62 }
  0xa6   : > { %761 = vmatmul.mubr.bf16.gmra.mrb[16].mxu0 %v499_v53  ;;  %2339 = vmatmul.mubr.bf16.vlgmr.msra.gmra.mrb[16].mxu1 %v3003_v7  ;;  %v438_v7 = vmul.f32 %v2942_v15, %v399_v1  ;;  %v545_v15 = vlaneseq }
  0xa7   : > { %770 = vmatprep.mubr.bf16.mxu0 %v2720_v0  ;;  %2342 = vmatprep.mubr.bf16.mxu1 %v497_v30 }
  0xa8   : > { %v477_v13 = vadd.f32 %v2954_v24, %v438_v7  ;;  %v3094_v24 = vshrl.u32 %v545_v15, 7 }
  0xaa   : > { %v502_v19 = vpack.c.bf16 %v478_v14, %v477_v13 }
  0xae   : > { %771 = vmatmul.mubr.bf16.gmra.mrb[20].mxu0 %v500_v59  ;;  %2343 = vmatmul.mubr.bf16.gmra.mrb[20].mxu1 %v498_v44 }
  0xaf   : > { %780 = vmatprep.mubr.bf16.mxu0 %v2720_v0  ;;  %2346 = vmatprep.mubr.bf16.mxu1 %v499_v53 }
  0xb6   : > { %781 = vmatmul.mubr.bf16.gmra.mrb[24].mxu0 %v501_v6  ;;  %2347 = vmatmul.mubr.bf16.gmra.mrb[24].mxu1 %v500_v59 }
  0xb7   : > { %790 = vmatprep.mubr.bf16.mxu0 %v2720_v0  ;;  %2350 = vmatprep.mubr.bf16.mxu1 %v501_v6 }
  0xbe   : > { %791 = vmatmul.mubr.bf16.gmra.mrb[28].mxu0 %v502_v19  ;;  %2351 = vmatmul.mubr.bf16.gmra.mrb[28].mxu1 %v502_v19 }
  0xbf   : > { %800 = vmatprep.mubr.bf16.mxu0 %v2720_v0  ;;  %2354 = vmatprep.mubr.bf16.mxu1 %v503_v20 }
  0xc6   : > { %801 = vmatmul.mubr.bf16.gmra.mrb[32].mxu0 %v503_v20  ;;  %2355 = vmatmul.mubr.bf16.gmra.mrb[32].mxu1 %v3000_v5 }
  0xc7   : > { %810 = vmatprep.mubr.bf16.mxu0 %v2720_v0  ;;  %2358 = vmatprep.mubr.bf16.mxu1 %v3006_v9 }
  0xce   : > { %811 = vmatmul.mubr.bf16.gmra.mrb[36].mxu0 %v3000_v5  ;;  %2359 = vmatmul.mubr.bf16.gmra.mrb[36].mxu1 %v3014_v17  ;;  %v547_v5 = vsub.s32 0, %v3094_v24 }
  0xcf   : > { %820 = vmatprep.mubr.bf16.mxu0 %v2720_v0  ;;  %2362 = vmatprep.mubr.bf16.mxu1 %v2971_v42  ;;  %v3100_v42 = vld [vmem:[%s3405_s4] sm:$0x7] }
  0xd6   : > { %821 = vmatmul.mubr.bf16.gmra.mrb[40].mxu0 %v3006_v9  ;;  %2363 = vmatmul.mubr.bf16.gmra.mrb[40].mxu1 %v3009_v11  ;;  %v551_v9 = vsub.s32 1, %v3094_v24 }
  0xd7   : > { %830 = vmatprep.mubr.bf16.mxu0 %v2720_v0  ;;  %2366 = vmatprep.mubr.bf16.mxu1 %v3030_v31  ;;  %v3104_v0 = vrot.slane %v3100_v42, %v547_v5 }
  0xde   : > { %831 = vmatmul.mubr.bf16.gmra.mrb[44].mxu0 %v3014_v17  ;;  %2367 = vmatmul.mubr.bf16.gmra.mrb[44].mxu1 %v3043_v45  ;;  %v3107_v17 = vrot.slane %v3100_v42, %v551_v9 }
 0x159   : > { %v722_v11 = vpop.f32.mrb[0].mxu0  ;;  %v842_v21 = vpop.f32.mrb[0].mxu1 }
 0x15a   : > { %v843_v22 = vadd.f32 %v842_v21, %v3104_v0  ;;  %v724_v23 = vpop.f32.mrb[1].mxu0  ;;  %v844_v25 = vpop.f32.mrb[1].mxu1  ;;  %v723_v28 = vadd.f32 %v722_v11, %v3104_v0 }
 0x15b   : > { %v726_v26 = vpop.f32.mrb[2].mxu0  ;;  %v846_v27 = vpop.f32.mrb[2].mxu1  ;;  %v725_v33 = vadd.f32 %v724_v23, %v3107_v17  ;;  %v845_v34 = vadd.f32 %v844_v25, %v3107_v17 }
 0x15c   : > { %v727_v29 = vadd.f32 %v726_v26, %v3104_v0  ;;  %v847_v30 = vadd.f32 %v846_v27, %v3104_v0  ;;  %v728_v31 = vpop.f32.mrb[3].mxu0  ;;  %v848_v32 = vpop.f32.mrb[3].mxu1  ;;  %v555_v26 = vsub.s32 2, %v3094_v24 }
 0x15d   : > { %v729_v35 = vadd.f32 %v728_v31, %v3107_v17  ;;  %v849_v36 = vadd.f32 %v848_v32, %v3107_v17 }
 0x15e   : > { %v2016_v37 = vpack.c.bf16 %v727_v29, %v723_v28  ;;  %v2076_v38 = vpack.c.bf16 %v847_v30, %v843_v22 }
 0x15f   : > { %v2096_v39 = vpack.c.bf16 %v729_v35, %v725_v33  ;;  %v2156_v40 = vpack.c.bf16 %v849_v36, %v845_v34 }
 0x160   : > { %2017 = vst [vmem:[%s3121_s8] sm:$0xff] %v2016_v37   ;;  %2264 = vst [vmem:[%s3121_s8 + $0x60] sm:$0xff] %v2076_v38  }
 0x161   : > { %2097 = vst [vmem:[%s3126_s22] sm:$0xff] %v2096_v39   ;;  %2279 = vst [vmem:[%s3126_s22 + $0x60] sm:$0xff] %v2156_v40   ;;  %v732_v43 = vpop.f32.mrb[4].mxu0  ;;  %v852_v44 = vpop.f32.mrb[4].mxu1  ;;  %v3164_v39 = vrot.slane %v3100_v42, %v555_v26 }
 0x162   : > { %v853_v45 = vadd.f32 %v852_v44, %v3104_v0  ;;  %v734_v46 = vpop.f32.mrb[5].mxu0  ;;  %v854_v47 = vpop.f32.mrb[5].mxu1  ;;  %v733_v50 = vadd.f32 %v732_v43, %v3104_v0 }
 0x163   : > { %v736_v48 = vpop.f32.mrb[6].mxu0  ;;  %v856_v49 = vpop.f32.mrb[6].mxu1  ;;  %v735_v55 = vadd.f32 %v734_v46, %v3107_v17  ;;  %v855_v56 = vadd.f32 %v854_v47, %v3107_v17 }
 0x164   : > { %v737_v51 = vadd.f32 %v736_v48, %v3104_v0  ;;  %v857_v52 = vadd.f32 %v856_v49, %v3104_v0  ;;  %v738_v53 = vpop.f32.mrb[7].mxu0  ;;  %v858_v54 = vpop.f32.mrb[7].mxu1 }
 0x165   : > { %v739_v57 = vadd.f32 %v738_v53, %v3107_v17  ;;  %v859_v41 = vadd.f32 %v858_v54, %v3107_v17 }
 0x166   : > { %v2021_v58 = vpack.c.bf16 %v737_v51, %v733_v50  ;;  %v2081_v59 = vpack.c.bf16 %v857_v52, %v853_v45 }
 0x167   : > { %v2101_v60 = vpack.c.bf16 %v739_v57, %v735_v55  ;;  %v2161_v61 = vpack.c.bf16 %v859_v41, %v855_v56 }
 0x168   : > { %2253 = vst [vmem:[%s3121_s8 + $0x8] sm:$0xff] %v2021_v58   ;;  %2265 = vst [vmem:[%s3121_s8 + $0x68] sm:$0xff] %v2081_v59  }
 0x169   : > { %2268 = vst [vmem:[%s3126_s22 + $0x8] sm:$0xff] %v2101_v60   ;;  %2280 = vst [vmem:[%s3126_s22 + $0x68] sm:$0xff] %v2161_v61   ;;  %v742_v62 = vpop.f32.mrb[8].mxu0  ;;  %v862_v63 = vpop.f32.mrb[8].mxu1 }
 0x16a   : > { %v863_v1 = vadd.f32 %v862_v63, %v3104_v0  ;;  %v744_v2 = vpop.f32.mrb[9].mxu0  ;;  %v864_v3 = vpop.f32.mrb[9].mxu1  ;;  %v743_v7 = vadd.f32 %v742_v62, %v3104_v0 }
 0x16b   : > { %v746_v4 = vpop.f32.mrb[10].mxu0  ;;  %v866_v6 = vpop.f32.mrb[10].mxu1  ;;  %v745_v14 = vadd.f32 %v744_v2, %v3107_v17  ;;  %v865_v16 = vadd.f32 %v864_v3, %v3107_v17 }
 0x16c   : > { %v747_v8 = vadd.f32 %v746_v4, %v3104_v0  ;;  %v867_v10 = vadd.f32 %v866_v6, %v3104_v0  ;;  %v748_v12 = vpop.f32.mrb[11].mxu0  ;;  %v868_v13 = vpop.f32.mrb[11].mxu1 }
 0x16d   : > { %v749_v18 = vadd.f32 %v748_v12, %v3107_v17  ;;  %v869_v19 = vadd.f32 %v868_v13, %v3107_v17 }
 0x16e   : > { %v2026_v20 = vpack.c.bf16 %v747_v8, %v743_v7  ;;  %v2086_v15 = vpack.c.bf16 %v867_v10, %v863_v1 }
 0x16f   : > { %v2106_v5 = vpack.c.bf16 %v749_v18, %v745_v14  ;;  %v2166_v9 = vpack.c.bf16 %v869_v19, %v865_v16 }
 0x170   : > { %2254 = vst [vmem:[%s3121_s8 + $0x10] sm:$0xff] %v2026_v20   ;;  %2266 = vst [vmem:[%s3121_s8 + $0x70] sm:$0xff] %v2086_v15  }
 0x171   : > { %2269 = vst [vmem:[%s3126_s22 + $0x10] sm:$0xff] %v2106_v5   ;;  %2281 = vst [vmem:[%s3126_s22 + $0x70] sm:$0xff] %v2166_v9   ;;  %v752_v11 = vpop.f32.mrb[12].mxu0  ;;  %v872_v21 = vpop.f32.mrb[12].mxu1 }
 0x172   : > { %v873_v22 = vadd.f32 %v872_v21, %v3104_v0  ;;  %v754_v23 = vpop.f32.mrb[13].mxu0  ;;  %v874_v25 = vpop.f32.mrb[13].mxu1  ;;  %v753_v29 = vadd.f32 %v752_v11, %v3104_v0 }
 0x173   : > { %v756_v27 = vpop.f32.mrb[14].mxu0  ;;  %v876_v28 = vpop.f32.mrb[14].mxu1  ;;  %v755_v34 = vadd.f32 %v754_v23, %v3107_v17  ;;  %v875_v35 = vadd.f32 %v874_v25, %v3107_v17 }
 0x174   : > { %v757_v30 = vadd.f32 %v756_v27, %v3104_v0  ;;  %v877_v31 = vadd.f32 %v876_v28, %v3104_v0  ;;  %v758_v32 = vpop.f32.mrb[15].mxu0  ;;  %v878_v33 = vpop.f32.mrb[15].mxu1 }
 0x175   : > { %v759_v24 = vadd.f32 %v758_v32, %v3107_v17  ;;  %v879_v36 = vadd.f32 %v878_v33, %v3107_v17 }
 0x176   : > { %v2031_v37 = vpack.c.bf16 %v757_v30, %v753_v29  ;;  %v2091_v38 = vpack.c.bf16 %v877_v31, %v873_v22 }
 0x177   : > { %v2111_v40 = vpack.c.bf16 %v759_v24, %v755_v34  ;;  %v2171_v43 = vpack.c.bf16 %v879_v36, %v875_v35 }
 0x178   : > { %2255 = vst [vmem:[%s3121_s8 + $0x18] sm:$0xff] %v2031_v37   ;;  %2267 = vst [vmem:[%s3121_s8 + $0x78] sm:$0xff] %v2091_v38  }
 0x179   : > { %2270 = vst [vmem:[%s3126_s22 + $0x18] sm:$0xff] %v2111_v40   ;;  %2282 = vst [vmem:[%s3126_s22 + $0x78] sm:$0xff] %v2171_v43   ;;  %v762_v44 = vpop.f32.mrb[16].mxu0  ;;  %v2340_v45 = vpop.f32.mrb[16].mxu1 }
 0x17a   : > { %v924_v46 = vadd.f32 %v2340_v45, %v3164_v39  ;;  %v764_v47 = vpop.f32.mrb[17].mxu0  ;;  %v915_v48 = vpop.f32.mrb[17].mxu1  ;;  %v763_v51 = vadd.f32 %v762_v44, %v3104_v0 }
 0x17b   : > { %v766_v49 = vpop.f32.mrb[18].mxu0  ;;  %v2341_v50 = vpop.f32.mrb[18].mxu1  ;;  %v765_v55 = vadd.f32 %v764_v47, %v3107_v17  ;;  %v916_v56 = vadd.f32 %v915_v48, %v3164_v39 }
 0x17c   : > { %v767_v42 = vadd.f32 %v766_v49, %v3104_v0  ;;  %v927_v52 = vadd.f32 %v2341_v50, %v3164_v39  ;;  %v768_v53 = vpop.f32.mrb[19].mxu0  ;;  %v918_v54 = vpop.f32.mrb[19].mxu1 }
 0x17d   : > { %v769_v57 = vadd.f32 %v768_v53, %v3107_v17  ;;  %v919_v41 = vadd.f32 %v918_v54, %v3164_v39 }
 0x17e   : > { %v2036_v58 = vpack.c.bf16 %v767_v42, %v763_v51  ;;  %v2181_v59 = vpack.c.bf16 %v927_v52, %v924_v46 }
 0x17f   : > { %v2116_v60 = vpack.c.bf16 %v769_v57, %v765_v55  ;;  %v2176_v61 = vpack.c.bf16 %v919_v41, %v916_v56 }
 0x180   : > { %2256 = vst [vmem:[%s3121_s8 + $0x20] sm:$0xff] %v2036_v58   ;;  %2283 = vst [vmem:[%s3180_s3 + $0x8] sm:$0xff] %v2181_v59  }
 0x181   : > { %2271 = vst [vmem:[%s3126_s22 + $0x20] sm:$0xff] %v2116_v60   ;;  %2177 = vst [vmem:[%s3180_s3] sm:$0xff] %v2176_v61   ;;  %v772_v62 = vpop.f32.mrb[20].mxu0  ;;  %v2344_v63 = vpop.f32.mrb[20].mxu1 }
 0x182   : > { %v940_v1 = vadd.f32 %v2344_v63, %v3164_v39  ;;  %v774_v2 = vpop.f32.mrb[21].mxu0  ;;  %v931_v3 = vpop.f32.mrb[21].mxu1  ;;  %v773_v7 = vadd.f32 %v772_v62, %v3104_v0 }
 0x183   : > { %v776_v4 = vpop.f32.mrb[22].mxu0  ;;  %v2345_v6 = vpop.f32.mrb[22].mxu1  ;;  %v775_v14 = vadd.f32 %v774_v2, %v3107_v17  ;;  %v932_v16 = vadd.f32 %v931_v3, %v3164_v39 }
 0x184   : > { %v777_v8 = vadd.f32 %v776_v4, %v3104_v0  ;;  %v943_v10 = vadd.f32 %v2345_v6, %v3164_v39  ;;  %v778_v12 = vpop.f32.mrb[23].mxu0  ;;  %v934_v13 = vpop.f32.mrb[23].mxu1 }
 0x185   : > { %v779_v18 = vadd.f32 %v778_v12, %v3107_v17  ;;  %v935_v19 = vadd.f32 %v934_v13, %v3164_v39 }
 0x186   : > { %v2041_v20 = vpack.c.bf16 %v777_v8, %v773_v7  ;;  %v2191_v15 = vpack.c.bf16 %v943_v10, %v940_v1 }
 0x187   : > { %v2121_v5 = vpack.c.bf16 %v779_v18, %v775_v14  ;;  %v2186_v9 = vpack.c.bf16 %v935_v19, %v932_v16 }
 0x188   : > { %2257 = vst [vmem:[%s3121_s8 + $0x28] sm:$0xff] %v2041_v20   ;;  %2285 = vst [vmem:[%s3180_s3 + $0x18] sm:$0xff] %v2191_v15  }
 0x189   : > { %2272 = vst [vmem:[%s3126_s22 + $0x28] sm:$0xff] %v2121_v5   ;;  %2284 = vst [vmem:[%s3180_s3 + $0x10] sm:$0xff] %v2186_v9   ;;  %v782_v11 = vpop.f32.mrb[24].mxu0  ;;  %v2348_v21 = vpop.f32.mrb[24].mxu1 }
 0x18a   : > { %v956_v22 = vadd.f32 %v2348_v21, %v3164_v39  ;;  %v784_v23 = vpop.f32.mrb[25].mxu0  ;;  %v947_v25 = vpop.f32.mrb[25].mxu1  ;;  %v783_v28 = vadd.f32 %v782_v11, %v3104_v0 }
 0x18b   : > { %v786_v26 = vpop.f32.mrb[26].mxu0  ;;  %v2349_v27 = vpop.f32.mrb[26].mxu1  ;;  %v785_v33 = vadd.f32 %v784_v23, %v3107_v17  ;;  %v948_v34 = vadd.f32 %v947_v25, %v3164_v39 }
 0x18c   : > { %v787_v29 = vadd.f32 %v786_v26, %v3104_v0  ;;  %v959_v30 = vadd.f32 %v2349_v27, %v3164_v39  ;;  %v788_v31 = vpop.f32.mrb[27].mxu0  ;;  %v950_v32 = vpop.f32.mrb[27].mxu1 }
 0x18d   : > { %v789_v35 = vadd.f32 %v788_v31, %v3107_v17  ;;  %v951_v24 = vadd.f32 %v950_v32, %v3164_v39 }
 0x18e   : > { %v2046_v36 = vpack.c.bf16 %v787_v29, %v783_v28  ;;  %v2201_v37 = vpack.c.bf16 %v959_v30, %v956_v22 }
 0x18f   : > { %v2126_v38 = vpack.c.bf16 %v789_v35, %v785_v33  ;;  %v2196_v40 = vpack.c.bf16 %v951_v24, %v948_v34 }
 0x190   : > { %2258 = vst [vmem:[%s3121_s8 + $0x30] sm:$0xff] %v2046_v36   ;;  %2287 = vst [vmem:[%s3180_s3 + $0x28] sm:$0xff] %v2201_v37  }
 0x191   : > { %2273 = vst [vmem:[%s3126_s22 + $0x30] sm:$0xff] %v2126_v38   ;;  %2286 = vst [vmem:[%s3180_s3 + $0x20] sm:$0xff] %v2196_v40   ;;  %v792_v43 = vpop.f32.mrb[28].mxu0  ;;  %v2352_v44 = vpop.f32.mrb[28].mxu1 }
 0x192   : > { %v972_v45 = vadd.f32 %v2352_v44, %v3164_v39  ;;  %v794_v46 = vpop.f32.mrb[29].mxu0  ;;  %v963_v47 = vpop.f32.mrb[29].mxu1  ;;  %v793_v50 = vadd.f32 %v792_v43, %v3104_v0 }
 0x193   : > { %v796_v48 = vpop.f32.mrb[30].mxu0  ;;  %v2353_v49 = vpop.f32.mrb[30].mxu1  ;;  %v795_v54 = vadd.f32 %v794_v46, %v3107_v17  ;;  %v964_v55 = vadd.f32 %v963_v47, %v3164_v39 }
 0x194   : > { %v797_v51 = vadd.f32 %v796_v48, %v3104_v0  ;;  %v975_v42 = vadd.f32 %v2353_v49, %v3164_v39  ;;  %v798_v52 = vpop.f32.mrb[31].mxu0  ;;  %v966_v53 = vpop.f32.mrb[31].mxu1 }
 0x195   : > { %v799_v56 = vadd.f32 %v798_v52, %v3107_v17  ;;  %v967_v57 = vadd.f32 %v966_v53, %v3164_v39 }
 0x196   : > { %v2051_v41 = vpack.c.bf16 %v797_v51, %v793_v50  ;;  %v2211_v58 = vpack.c.bf16 %v975_v42, %v972_v45 }
 0x197   : > { %v2131_v59 = vpack.c.bf16 %v799_v56, %v795_v54  ;;  %v2206_v60 = vpack.c.bf16 %v967_v57, %v964_v55 }
 0x198   : > { %2259 = vst [vmem:[%s3121_s8 + $0x38] sm:$0xff] %v2051_v41   ;;  %2289 = vst [vmem:[%s3180_s3 + $0x38] sm:$0xff] %v2211_v58  }
 0x199   : > { %2274 = vst [vmem:[%s3126_s22 + $0x38] sm:$0xff] %v2131_v59   ;;  %2288 = vst [vmem:[%s3180_s3 + $0x30] sm:$0xff] %v2206_v60   ;;  %v802_v61 = vpop.f32.mrb[32].mxu0  ;;  %v2356_v62 = vpop.f32.mrb[32].mxu1 }
 0x19a   : > { %v988_v63 = vadd.f32 %v2356_v62, %v3164_v39  ;;  %v804_v1 = vpop.f32.mrb[33].mxu0  ;;  %v979_v2 = vpop.f32.mrb[33].mxu1  ;;  %v803_v6 = vadd.f32 %v802_v61, %v3104_v0 }
 0x19b   : > { %v806_v3 = vpop.f32.mrb[34].mxu0  ;;  %v2357_v4 = vpop.f32.mrb[34].mxu1  ;;  %v805_v13 = vadd.f32 %v804_v1, %v3107_v17  ;;  %v980_v14 = vadd.f32 %v979_v2, %v3164_v39 }
 0x19c   : > { %v807_v7 = vadd.f32 %v806_v3, %v3104_v0  ;;  %v991_v8 = vadd.f32 %v2357_v4, %v3164_v39  ;;  %v808_v10 = vpop.f32.mrb[35].mxu0  ;;  %v982_v12 = vpop.f32.mrb[35].mxu1 }
 0x19d   : > { %v809_v16 = vadd.f32 %v808_v10, %v3107_v17  ;;  %v983_v18 = vadd.f32 %v982_v12, %v3164_v39 }
 0x19e   : > { %v2056_v19 = vpack.c.bf16 %v807_v7, %v803_v6  ;;  %v2221_v20 = vpack.c.bf16 %v991_v8, %v988_v63 }
 0x19f   : > { %v2136_v15 = vpack.c.bf16 %v809_v16, %v805_v13  ;;  %v2216_v5 = vpack.c.bf16 %v983_v18, %v980_v14 }
 0x1a0   : > { %2260 = vst [vmem:[%s3121_s8 + $0x40] sm:$0xff] %v2056_v19   ;;  %2291 = vst [vmem:[%s3180_s3 + $0x48] sm:$0xff] %v2221_v20  }
 0x1a1   : > { %2275 = vst [vmem:[%s3126_s22 + $0x40] sm:$0xff] %v2136_v15   ;;  %2290 = vst [vmem:[%s3180_s3 + $0x40] sm:$0xff] %v2216_v5   ;;  %v812_v9 = vpop.f32.mrb[36].mxu0  ;;  %v2360_v11 = vpop.f32.mrb[36].mxu1 }
 0x1a2   : > { %v1004_v21 = vadd.f32 %v2360_v11, %v3164_v39  ;;  %v814_v22 = vpop.f32.mrb[37].mxu0  ;;  %v995_v23 = vpop.f32.mrb[37].mxu1  ;;  %v813_v27 = vadd.f32 %v812_v9, %v3104_v0 }
 0x1a3   : > { %v816_v25 = vpop.f32.mrb[38].mxu0  ;;  %v2361_v26 = vpop.f32.mrb[38].mxu1  ;;  %v815_v32 = vadd.f32 %v814_v22, %v3107_v17  ;;  %v996_v33 = vadd.f32 %v995_v23, %v3164_v39 }
 0x1a4   : > { %v817_v28 = vadd.f32 %v816_v25, %v3104_v0  ;;  %v1007_v29 = vadd.f32 %v2361_v26, %v3164_v39  ;;  %v818_v30 = vpop.f32.mrb[39].mxu0  ;;  %v998_v31 = vpop.f32.mrb[39].mxu1 }
 0x1a5   : > { %v819_v34 = vadd.f32 %v818_v30, %v3107_v17  ;;  %v999_v35 = vadd.f32 %v998_v31, %v3164_v39 }
 0x1a6   : > { %v2061_v24 = vpack.c.bf16 %v817_v28, %v813_v27  ;;  %v2231_v36 = vpack.c.bf16 %v1007_v29, %v1004_v21 }
 0x1a7   : > { %v2141_v37 = vpack.c.bf16 %v819_v34, %v815_v32  ;;  %v2226_v38 = vpack.c.bf16 %v999_v35, %v996_v33 }
 0x1a8   : > { %2261 = vst [vmem:[%s3121_s8 + $0x48] sm:$0xff] %v2061_v24   ;;  %2293 = vst [vmem:[%s3180_s3 + $0x58] sm:$0xff] %v2231_v36  }
 0x1a9   : > { %2276 = vst [vmem:[%s3126_s22 + $0x48] sm:$0xff] %v2141_v37   ;;  %2292 = vst [vmem:[%s3180_s3 + $0x50] sm:$0xff] %v2226_v38   ;;  %v822_v40 = vpop.f32.mrb[40].mxu0  ;;  %v2364_v43 = vpop.f32.mrb[40].mxu1 }
 0x1aa   : > { %v1020_v44 = vadd.f32 %v2364_v43, %v3164_v39  ;;  %v824_v45 = vpop.f32.mrb[41].mxu0  ;;  %v1011_v46 = vpop.f32.mrb[41].mxu1  ;;  %v823_v49 = vadd.f32 %v822_v40, %v3104_v0 }
 0x1ab   : > { %v826_v47 = vpop.f32.mrb[42].mxu0  ;;  %v2365_v48 = vpop.f32.mrb[42].mxu1  ;;  %v825_v53 = vadd.f32 %v824_v45, %v3107_v17  ;;  %v1012_v54 = vadd.f32 %v1011_v46, %v3164_v39 }
 0x1ac   : > { %v827_v50 = vadd.f32 %v826_v47, %v3104_v0  ;;  %v1023_v51 = vadd.f32 %v2365_v48, %v3164_v39  ;;  %v828_v42 = vpop.f32.mrb[43].mxu0  ;;  %v1014_v52 = vpop.f32.mrb[43].mxu1 }
 0x1ad   : > { %v829_v55 = vadd.f32 %v828_v42, %v3107_v17  ;;  %v1015_v56 = vadd.f32 %v1014_v52, %v3164_v39 }
 0x1ae   : > { %v2066_v57 = vpack.c.bf16 %v827_v50, %v823_v49  ;;  %v2241_v41 = vpack.c.bf16 %v1023_v51, %v1020_v44 }
 0x1af   : > { %v2146_v58 = vpack.c.bf16 %v829_v55, %v825_v53  ;;  %v2236_v59 = vpack.c.bf16 %v1015_v56, %v1012_v54 }
 0x1b0   : > { %2262 = vst [vmem:[%s3121_s8 + $0x50] sm:$0xff] %v2066_v57   ;;  %2295 = vst [vmem:[%s3180_s3 + $0x68] sm:$0xff] %v2241_v41  }
 0x1b1   : > { %2277 = vst [vmem:[%s3126_s22 + $0x50] sm:$0xff] %v2146_v58   ;;  %2294 = vst [vmem:[%s3180_s3 + $0x60] sm:$0xff] %v2236_v59   ;;  %v832_v60 = vpop.f32.mrb[44].mxu0  ;;  %v2368_v61 = vpop.f32.mrb[44].mxu1 }
 0x1b2   : > { %v1036_v62 = vadd.f32 %v2368_v61, %v3164_v39  ;;  %v834_v63 = vpop.f32.mrb[45].mxu0  ;;  %v1027_v1 = vpop.f32.mrb[45].mxu1  ;;  %v833_v4 = vadd.f32 %v832_v60, %v3104_v0 }
 0x1b3   : > { %v836_v2 = vpop.f32.mrb[46].mxu0  ;;  %v2369_v3 = vpop.f32.mrb[46].mxu1  ;;  %v835_v12 = vadd.f32 %v834_v63, %v3107_v17  ;;  %v1028_v13 = vadd.f32 %v1027_v1, %v3164_v39 }
 0x1b4   : > { %v837_v6 = vadd.f32 %v836_v2, %v3104_v0  ;;  %v1039_v7 = vadd.f32 %v2369_v3, %v3164_v39  ;;  %v838_v8 = vpop.f32.mrb[47].mxu0  ;;  %v1030_v10 = vpop.f32.mrb[47].mxu1 }
 0x1b5   : > { %v839_v14 = vadd.f32 %v838_v8, %v3107_v17  ;;  %v1031_v16 = vadd.f32 %v1030_v10, %v3164_v39 }
 0x1b6   : > { %v2071_v0 = vpack.c.bf16 %v837_v6, %v833_v4  ;;  %v2251_v18 = vpack.c.bf16 %v1039_v7, %v1036_v62 }
 0x1b7   : > { %v2151_v19 = vpack.c.bf16 %v839_v14, %v835_v12  ;;  %v2246_v20 = vpack.c.bf16 %v1031_v16, %v1028_v13 }
 0x1b8   : > { %2263 = vst [vmem:[%s3121_s8 + $0x58] sm:$0xff] %v2071_v0   ;;  %2297 = vst [vmem:[%s3180_s3 + $0x78] sm:$0xff] %v2251_v18   ;;  %s2572_s8 = scalar_lea.vmem %s2571_s13, 4096 }
 0x1b9   : > { %2278 = vst [vmem:[%s3126_s22 + $0x58] sm:$0xff] %v2151_v19   ;;  %2296 = vst [vmem:[%s3180_s3 + $0x70] sm:$0xff] %v2246_v20   ;;  %p2574_p5 = scmp.lt.s32.totalorder %s2572_s8, %s2566_s2 }
 0x1bb   : > { %p2575_p9 = por %p2574_p5, %p2573_p0 }
 0x1bd   : > { %p2576_p1 = pnand %p2575_p9, %p2569_p11 }
 0x1bf   : > { %2579 = shalt.err (!%p2576_p1)
}
 0x1c0   : > { %s2580_s22 = scalar_lea.hbm %s3273_s16, 2048  ;;  %s2584_s19 = scalar_lea.hbm %s3406_s5, 4096 }
 0x1c1   : > { %p2581_p2 = scmp.ne.s32.totalorder %s3273_s16, %s2580_s22  ;;  %p2585_p13 = scmp.lt.u32.totalorder %s3273_s16, %s3406_s5 }
 0x1c2   : > { %p2586_p4 = scmp.lt.u32.totalorder %s2584_s19, %s2580_s22  ;;  %p2588_p8 = scmp.lt.u32.totalorder %s2580_s22, %s3273_s16 }
 0x1c3   : > { %p2582_p3 = pnand %p2581_p2, %p2860_p10 }
 0x1c4   : > { %p2587_p6 = por %p2586_p4, %p2585_p13 }
 0x1c5   : > { %p2583_p7 = pneg %p2582_p3 }
 0x1c6   : > { %p2589_p12 = por %p2588_p8, %p2587_p6 }
 0x1c8   : > { %p2590_p11 = pnand %p2589_p12, %p2583_p7 }
 0x1ca   : > { %2593 = shalt.err (!%p2590_p11)
}
 0x1cb   : > { %s2722_s2 = smov 64   ;;  %s2723_s13 = smov 4  }
 0x1cc   : > { %2392 = dma.vmem_to_hbm [thread:$0]  (%p2860_p10), %s3275_s18, 2048, %s3273_s16, %s1523_s1, %s2722_s2, %s2722_s2, %s2723_s13  }
 0x1cd   : > { %s3433_s8 = sand.u32 1, %s2797_s30   ;;  %s2594_s3 = scalar_lea.vmem %s3282_s14, 2048 }
 0x1ce   : > { %s3324_s22 = scalar_lea.sflag [#allocation9], %s3433_s8  ;;  %p2595_p0 = scmp.ne.s32.totalorder %s3282_s14, %s2594_s3 }
 0x1cf   : > { %s2724_s11 = smov [#allocation8]  }
 0x1d0   : > { %p2596_p5 = pnand %p2595_p0, %p2860_p10  ;;  %s2598_s19 = sshll.u32 %s2724_s11, 4  ;;  %s2599_s19 = int_to_ptr.vmem [resolvable:$false] %s2598_s19 }
 0x1d1   : > { %s2600_s12 = scalar_lea.vmem %s2599_s19, 4096  ;;  %p2601_p1 = scmp.lt.s32.totalorder %s3282_s14, %s2599_s19 }
 0x1d2   : > { %p2597_p9 = pneg %p2596_p5  ;;  %p2602_p2 = scmp.lt.s32.totalorder %s2600_s12, %s2594_s3 }
 0x1d4   : > { %p2603_p3 = por %p2602_p2, %p2601_p1 }
 0x1d6   : > { %p2604_p7 = pnand %p2603_p3, %p2597_p9 }
 0x1d8   : > { %2607 = shalt.err (!%p2604_p7)
}
 0x1d9   : > { %s2608_s1 = scalar_lea.hbm %s3280_s9, 2048  ;;  %s2612_s18 = scalar_lea.hbm %s3407_s6, 4096 }
 0x1da   : > { %p2609_p13 = scmp.ne.s32.totalorder %s3280_s9, %s2608_s1  ;;  %p2613_p8 = scmp.lt.u32.totalorder %s3280_s9, %s3407_s6 }
 0x1db   : > { %p2614_p12 = scmp.lt.u32.totalorder %s2612_s18, %s2608_s1  ;;  %p2616_p0 = scmp.lt.u32.totalorder %s2608_s1, %s3280_s9 }
 0x1dc   : > { %p2610_p4 = pnand %p2609_p13, %p2860_p10 }
 0x1dd   : > { %p2615_p11 = por %p2614_p12, %p2613_p8 }
 0x1de   : > { %p2611_p6 = pneg %p2610_p4 }
 0x1df   : > { %p2617_p5 = por %p2616_p0, %p2615_p11 }
 0x1e1   : > { %p2618_p9 = pnand %p2617_p5, %p2611_p6 }
 0x1e3   : > { %2621 = shalt.err (!%p2618_p9)
}
 0x1e4   : > { %2393 = dma.vmem_to_hbm [thread:$0]  (%p2860_p10), %s3282_s14, 2048, %s3280_s9, %s3324_s22, %s2722_s2, %s2722_s2, %s2723_s13  }
 0x1e5   : > { %s2622_s8 = scalar_lea.vmem %s3291_s27, 2048  ;;  %s2725_s3 = smov [#allocation10]  }
 0x1e6   : > { %p2623_p1 = scmp.ne.s32.totalorder %s3291_s27, %s2622_s8  ;;  %s2626_s11 = sshll.u32 %s2725_s3, 4  ;;  %s2627_s11 = int_to_ptr.vmem [resolvable:$false] %s2626_s11 }
 0x1e7   : > { %s2628_s19 = scalar_lea.vmem %s2627_s11, 4096  ;;  %p2629_p7 = scmp.lt.s32.totalorder %s3291_s27, %s2627_s11 }
 0x1e8   : > { %p2624_p2 = pnand %p2623_p1, %p2860_p10  ;;  %p2630_p13 = scmp.lt.s32.totalorder %s2628_s19, %s2622_s8 }
 0x1ea   : > { %p2625_p3 = pneg %p2624_p2  ;;  %p2631_p4 = por %p2630_p13, %p2629_p7 }
 0x1ec   : > { %p2632_p6 = pnand %p2631_p4, %p2625_p3 }
 0x1ee   : > { %2635 = shalt.err (!%p2632_p6)
}
 0x1ef   : > { %s2636_s9 = scalar_lea.hbm %s3289_s0, 2048  ;;  %s2640_s1 = scalar_lea.hbm %s3408_s7, 4096 }
 0x1f0   : > { %p2637_p8 = scmp.ne.s32.totalorder %s3289_s0, %s2636_s9  ;;  %p2641_p0 = scmp.lt.u32.totalorder %s3289_s0, %s3408_s7 }
 0x1f1   : > { %p2642_p5 = scmp.lt.u32.totalorder %s2640_s1, %s2636_s9  ;;  %p2644_p1 = scmp.lt.u32.totalorder %s2636_s9, %s3289_s0 }
 0x1f2   : > { %p2638_p12 = pnand %p2637_p8, %p2860_p10 }
 0x1f3   : > { %p2643_p9 = por %p2642_p5, %p2641_p0 }
 0x1f4   : > { %p2639_p11 = pneg %p2638_p12 }
 0x1f5   : > { %p2645_p2 = por %p2644_p1, %p2643_p9 }
 0x1f7   : > { %p2646_p3 = pnand %p2645_p2, %p2639_p11 }
 0x1f9   : > { %2649 = shalt.err (!%p2646_p3)
}
 0x1fa   : > { %2394 = dma.vmem_to_hbm [thread:$0]  (%p2860_p10), %s3291_s27, 2048, %s3289_s0, %s3324_s22, %s2722_s2, %s2722_s2, %s2723_s13  }
 0x1fb PF: > { %s1599_s18 = sand.u32 1, %s2692_s24   ;;  %p3434_p7 = scmp.ne.s32.totalorder %s3418_s10, 0 }
 0x1fc   : > { %p3435_p13 = scmp.ge.s32.totalorder %s2712_s29, 2  ;;  %s1600_s16 = scalar_lea.sflag [#allocation4], %s1599_s18 }
 0x1fe   : > { %p2407_p4 = pnand %p3435_p13, %p3434_p7 }
 0x200   : > { %2683 = dma.done.wait (!%p2407_p4), %s1600_s16, 2048  }
 0x201   : > { %2685 = vsyncadd (!%p2407_p4), %s1600_s16, 4294965248  ;;  %s3436_s21 = sadd.s32 4294967294, %s2712_s29  }
 0x202   : > { %s1608_s20 = sand.u32 1, %s3436_s21  }
 0x203   : > { %s1609_s8 = scalar_lea.sflag [#allocation9], %s1608_s20 }
 0x204   : > { %2687 = dma.done.wait (!%p2407_p4), %s1609_s8, 4096  }
 0x205   : > { %2689 = vsyncadd (!%p2407_p4), %s1609_s8, 4294963200  ;;  %s28_s29 = sadd.s32 1, %s2712_s29   ;;  %s3437_s24 = smov %s2696_s25 }
 0x206   : > { %p25_p10 = scmp.ge.s32.totalorder %s28_s29, 4   ;;  %s3438_s25 = smov %s2700_s26 }
 0x207   : > { %s3439_s26 = smov %s2869_s23  ;;  %s3440_s27 = smov %s2708_s28 }
 0x208   : > { %s3441_s28 = smov %s3443_s15  ;;  %27 = sbr.rel (!%p25_p10) target bundleno = 14 (0xe), region = 127 }
 0x20f   :  { %1623 = vsyncpa [#allocation3], 1 }
 0x210   :  { %1625 = vsyncpa [#allocation3 + $0x1], 1 }
 0x211   :  { %1626 = vsyncpa [#allocation6], 1 }
 0x212   :  { %1627 = vsyncpa [#allocation4], 1 }
 0x213   :  { %1629 = vsyncpa [#allocation4 + $0x1], 1 }
 0x214   :  { %1630 = vsyncpa [#allocation9], 1 }
 0x215   :  { %1632 = vsyncpa [#allocation9 + $0x1], 1 }

</bundles_post_ra>
